<compile_context>
chip_gen: v7x
topology: tpu7x:2x2x1
jax: 0.10.0
libtpu: 0.0.40
codegen_flags: <defaults>
</compile_context>

<pallas_src>
import functools
import math

import jax
import jax.numpy as jnp
from jax.experimental import pallas as pl
from jax.experimental.pallas import tpu as pltpu


def _is_pow2(n):
    return n >= 1 and (n & (n - 1)) == 0


def _cdiv(a, b):
    return -(-a // b)


def _round_up(a, b):
    return _cdiv(a, b) * b


def _n_passes(group_size):
    if group_size <= 1:
        return 0
    if _is_pow2(group_size):
        lg = group_size.bit_length() - 1
        return lg * (lg + 1) // 2
    return group_size


def _groupsort_kernel(x_ref, o_ref, *, group_size):
    """Sort every contiguous group of `group_size` lanes in DESCENDING order.

    Compare-exchange network over the lane axis: pltpu.roll (XLU) fetches the
    partner lane, max/min + select (VPU) perform the exchange.  All index masks
    are built once at shape (1, w) and broadcast across sublanes by the selects
    (hoisted out of the full-block VPU path).
    """
    x = x_ref[...]
    w = x.shape[-1]
    axis = x.ndim - 1
    lane = jax.lax.broadcasted_iota(jnp.int32, (1, w), 1)
    local = lane % group_size                       # index within each group

    if _is_pow2(group_size):
        # Bitonic sorting network: O(log^2 g) passes.  Valid because every
        # group starts at a lane offset that is a multiple of group_size.
        k = 2
        while k <= group_size:
            desc = (local & k) == 0                 # this block sorts descending
            j = k // 2
            while j >= 1:
                is_lower = (local & j) == 0         # partner lives at lane i + j
                take_max = is_lower == desc
                hi = pltpu.roll(x, shift=w - j, axis=axis)   # value from lane i + j
                lo = pltpu.roll(x, shift=j, axis=axis)       # value from lane i - j
                partner = jnp.where(is_lower, hi, lo)
                x = jnp.where(take_max, jnp.maximum(x, partner),
                              jnp.minimum(x, partner))
                j //= 2
            k *= 2
    else:
        # Odd-even transposition network (any group size): group_size passes.
        even = (local % 2) == 0
        not_last = local < (group_size - 1)
        not_first = local > 0
        masks = (
            (even & not_last, (~even) & not_first),    # even pass: pairs (0,1),(2,3)..
            ((~even) & not_last, even & not_first),    # odd pass:  pairs (1,2),(3,4)..
        )
        for t in range(group_size):
            first, second = masks[t % 2]
            nxt = pltpu.roll(x, shift=w - 1, axis=axis)   # value from lane i + 1
            prv = pltpu.roll(x, shift=1, axis=axis)       # value from lane i - 1
            # descending: larger element moves to the lower-index slot of the pair
            x = jnp.where(first, jnp.maximum(x, nxt),
                          jnp.where(second, jnp.minimum(x, prv), x))
    o_ref[...] = x


def _pick_fold(rows, c, max_lanes=4096):
    """Largest divisor k of rows with c*k <= max_lanes (prefer 128-aligned c*k)."""
    if c >= max_lanes:
        return 1
    kmax = min(rows, max_lanes // c)
    best, best128 = 1, 0
    for k in range(1, kmax + 1):
        if rows % k == 0:
            best = k
            if (c * k) % 128 == 0:
                best128 = k
    return best128 if best128 else best


def _vmem_budget():
    """(vmem_limit_bytes, target_block_bytes) sized for this TPU generation."""
    cap = 64 * 1024 * 1024                      # conservative fallback (v7x-sized)
    try:
        cap = int(getattr(pltpu.get_tpu_info(), "vmem_capacity_bytes", cap))
    except Exception:
        pass
    if cap >= 100 * 1024 * 1024:                # v5e / v6e: 128 MiB physical VMEM
        return 96 * 1024 * 1024, 8 * 1024 * 1024
    return 48 * 1024 * 1024, 4 * 1024 * 1024    # v7x: 64 MiB physical VMEM per TC


def _groupsort_2d(x2d, group_size):
    rows, c = x2d.shape
    k = _pick_fold(rows, c)
    r2, w = rows // k, c * k
    xf = x2d.reshape(r2, w)                     # free: row-major layout unchanged,
                                                # group boundaries preserved
    dsize = jnp.dtype(xf.dtype).itemsize
    sub = max(8, 32 // dsize)                   # native sublane tile: 8/f32, 16/bf16, 32/i8

    vmem_limit, target_block_bytes = _vmem_budget()
    row_bytes = w * dsize
    budget_rows = max(sub, (target_block_bytes // row_bytes) // sub * sub)

    if r2 <= sub:
        tm = r2                                 # tiny input: single full-dim block
    else:
        # Always split into >= 2 "parallel" blocks so both v7x TensorCores get
        # work; the extra grid step costs ~0.35us on single-core generations.
        half = _round_up(_cdiv(r2, 2), sub)
        tm = min(budget_rows, half)

    n_elems = r2 * w
    cost = pl.CostEstimate(
        flops=4 * _n_passes(group_size) * n_elems,
        transcendentals=0,
        bytes_accessed=2 * n_elems * dsize,
    )

    out = pl.pallas_call(
        functools.partial(_groupsort_kernel, group_size=group_size),
        out_shape=jax.ShapeDtypeStruct((r2, w), xf.dtype),
        grid_spec=pltpu.PrefetchScalarGridSpec(
            num_scalar_prefetch=0,
            grid=(_cdiv(r2, tm),),
            in_specs=[pl.BlockSpec((tm, w), lambda i: (i, 0))],
            out_specs=pl.BlockSpec((tm, w), lambda i: (i, 0)),
        ),
        compiler_params=pltpu.CompilerParams(
            dimension_semantics=("parallel",),
            vmem_limit_bytes=vmem_limit,
        ),
        cost_estimate=cost,
        input_output_aliases={0: 0},            # sort is in-place friendly
    )(xf)
    return out.reshape(rows, c)


def _groupsort(x, num_units, dim):
    ndim = x.ndim
    axis = dim % ndim
    c = x.shape[axis]
    assert c % num_units == 0, (
        f"Number of channels ({c}) is not a multiple of num_units ({num_units})")
    group_size = c // num_units
    if group_size == 1:
        return x
    moved = axis != ndim - 1
    # TODO(synk): for dim != -1 a strided BlockSpec over the remaining axes could
    # avoid the two moveaxis HBM passes; callers should prefer dim=-1.
    xm = jnp.moveaxis(x, axis, -1) if moved else x
    rows = math.prod(xm.shape[:-1]) if xm.ndim > 1 else 1
    out2d = _groupsort_2d(xm.reshape(rows, xm.shape[-1]), group_size)
    out = out2d.reshape(xm.shape)
    if moved:
        out = jnp.moveaxis(out, -1, axis)
    return out


@functools.partial(jax.jit, static_argnames=("num_units", "dim"))
def groupsort_forward(x, *, num_units, dim=-1):
    if jnp.iscomplexobj(x):
        # Matches the PyTorch forward exactly: concat real/imag on the LAST axis,
        # groupsort along `dim`, split on the last axis, recombine.
        # TODO(synk): the concat/split round trips add HBM passes; they could be
        # fused by sorting real/imag as two kernel operands when groups do not
        # straddle the real/imag boundary.
        xc = jnp.concatenate([jnp.real(x), jnp.imag(x)], axis=-1)
        s = _groupsort(xc, num_units, dim)
        half = s.shape[-1] // 2
        return jax.lax.complex(s[..., :half], s[..., half:])
    return _groupsort(x, num_units, dim)


if __name__ == "__main__":
    key = jax.random.PRNGKey(0)
    batch, seq, hidden = 2, 8, 32
    kx, kr, ki, ko = jax.random.split(key, 4)
    x = jax.random.normal(kx, (batch, seq, hidden), dtype=jnp.float32)

    def ref_groupsort(a, num_units):
        g = a.shape[-1] // num_units
        r = -jnp.sort(-a.reshape(*a.shape[:-1], num_units, g), axis=-1)
        return r.reshape(a.shape)

    # GroupSort(num_units=8, dim=-1) -> group_size = 4 (bitonic path)
    out = jax.block_until_ready(groupsort_forward(x, num_units=8, dim=-1))
    assert out.shape == x.shape and out.dtype == x.dtype
    assert jnp.allclose(out, ref_groupsort(x, 8))

    # GroupSort(num_units=16, dim=-1) -> group_size = 2 (MaxMin)
    out2 = jax.block_until_ready(groupsort_forward(x, num_units=16, dim=-1))
    assert jnp.allclose(out2, ref_groupsort(x, 16))

    # Non-power-of-two group size = 6 (odd-even transposition path)
    x3 = jax.random.normal(ko, (4, 24), dtype=jnp.float32)
    out3 = jax.block_until_ready(groupsort_forward(x3, num_units=4, dim=-1))
    assert jnp.allclose(out3, ref_groupsort(x3, 4))

    # Complex input: concat(real, imag) -> groups of 64/8 = 8 -> split/recombine
    xc = jax.lax.complex(
        jax.random.normal(kr, (batch, seq, hidden), dtype=jnp.float32),
        jax.random.normal(ki, (batch, seq, hidden), dtype=jnp.float32))
    outc = jax.block_until_ready(groupsort_forward(xc, num_units=8, dim=-1))
    cat = jnp.concatenate([jnp.real(xc), jnp.imag(xc)], axis=-1)
    refc_cat = ref_groupsort(cat, 8)
    refc = jax.lax.complex(refc_cat[..., :hidden], refc_cat[..., hidden:])
    assert outc.dtype == xc.dtype
    assert jnp.allclose(outc, refc)

    print("KERNEL_OK")
</pallas_src>

<mosaic_0001>
module attributes {stable_mosaic.version = 11 : i64} {
  func.func @_groupsort_kernel(%arg0: i32, %arg1: memref<1x512xf32, #tpu.memory_space<vmem>>, %arg2: memref<1x512xf32, #tpu.memory_space<vmem>>) attributes {dimension_semantics = [#tpu.dimension_semantics<parallel>], iteration_bounds = array<i64: 1>, scalar_prefetch = 0 : i64, scratch_operands = 0 : i64, tpu.core_type = #tpu.core_type<tc>, window_params = [{transform_indices = @transform_0, window_bounds = array<i64: 1, 512>}, {transform_indices = @transform_1, window_bounds = array<i64: 1, 512>}]} {
    %c0 = arith.constant 0 : index
    %c0_0 = arith.constant 0 : index
    %0 = vector.load %arg1[%c0, %c0_0] : memref<1x512xf32, #tpu.memory_space<vmem>>, vector<1x512xf32>
    %1 = tpu.iota {dimensions = array<i32: 1>} : vector<1x512xi32>
    %c4_i32 = arith.constant 4 : i32
    %c0_i32 = arith.constant 0 : i32
    %2 = arith.cmpi eq, %c4_i32, %c0_i32 : i32
    %c1_i32 = arith.constant 1 : i32
    %3 = arith.select %2, %c1_i32, %c4_i32 : i32
    %4 = vector.broadcast %3 : i32 to vector<1x512xi32>
    %5 = arith.remsi %1, %4 : vector<1x512xi32>
    %c0_i32_1 = arith.constant 0 : i32
    %6 = vector.broadcast %c0_i32_1 : i32 to vector<1x512xi32>
    %7 = arith.cmpi ne, %5, %6 : vector<1x512xi32>
    %c0_i32_2 = arith.constant 0 : i32
    %8 = vector.broadcast %c0_i32_2 : i32 to vector<1x512xi32>
    %9 = arith.cmpi slt, %5, %8 : vector<1x512xi32>
    %c0_i32_3 = arith.constant 0 : i32
    %10 = arith.cmpi slt, %3, %c0_i32_3 : i32
    %11 = vector.broadcast %10 : i1 to vector<1x512xi1>
    %12 = vector.broadcast %11 : vector<1x512xi1> to vector<1x512xi1>
    %13 = arith.xori %9, %12 : vector<1x512xi1>
    %14 = arith.andi %13, %7 : vector<1x512xi1>
    %15 = vector.broadcast %3 : i32 to vector<1x512xi32>
    %16 = arith.addi %5, %15 : vector<1x512xi32>
    %17 = arith.select %14, %16, %5 : vector<1x512xi1>, vector<1x512xi32>
    %c2_i32 = arith.constant 2 : i32
    %18 = vector.broadcast %c2_i32 : i32 to vector<1x512xi32>
    %19 = arith.andi %17, %18 : vector<1x512xi32>
    %c0_i32_4 = arith.constant 0 : i32
    %20 = vector.broadcast %c0_i32_4 : i32 to vector<1x512xi32>
    %21 = arith.cmpi eq, %19, %20 : vector<1x512xi32>
    %c1_i32_5 = arith.constant 1 : i32
    %22 = vector.broadcast %c1_i32_5 : i32 to vector<1x512xi32>
    %23 = arith.andi %17, %22 : vector<1x512xi32>
    %c0_i32_6 = arith.constant 0 : i32
    %24 = vector.broadcast %c0_i32_6 : i32 to vector<1x512xi32>
    %25 = arith.cmpi eq, %23, %24 : vector<1x512xi32>
    %26 = arith.xori %25, %21 : vector<1x512xi1>
    %cst = arith.constant dense<true> : vector<1x512xi1>
    %27 = arith.xori %26, %cst : vector<1x512xi1>
    %c511_i32 = arith.constant 511 : i32
    %28 = tpu.dynamic_rotate %0 by %c511_i32 dim 1 : vector<1x512xf32>, i32 -> vector<1x512xf32>
    %c1_i32_7 = arith.constant 1 : i32
    %29 = tpu.dynamic_rotate %0 by %c1_i32_7 dim 1 : vector<1x512xf32>, i32 -> vector<1x512xf32>
    %30 = arith.select %25, %28, %29 : vector<1x512xi1>, vector<1x512xf32>
    %31 = arith.maximumf %0, %30 : vector<1x512xf32>
    %32 = arith.minimumf %0, %30 : vector<1x512xf32>
    %33 = arith.select %27, %31, %32 : vector<1x512xi1>, vector<1x512xf32>
    %c4_i32_8 = arith.constant 4 : i32
    %34 = vector.broadcast %c4_i32_8 : i32 to vector<1x512xi32>
    %35 = arith.andi %17, %34 : vector<1x512xi32>
    %c0_i32_9 = arith.constant 0 : i32
    %36 = vector.broadcast %c0_i32_9 : i32 to vector<1x512xi32>
    %37 = arith.cmpi eq, %35, %36 : vector<1x512xi32>
    %c2_i32_10 = arith.constant 2 : i32
    %38 = vector.broadcast %c2_i32_10 : i32 to vector<1x512xi32>
    %39 = arith.andi %17, %38 : vector<1x512xi32>
    %c0_i32_11 = arith.constant 0 : i32
    %40 = vector.broadcast %c0_i32_11 : i32 to vector<1x512xi32>
    %41 = arith.cmpi eq, %39, %40 : vector<1x512xi32>
    %42 = arith.xori %41, %37 : vector<1x512xi1>
    %cst_12 = arith.constant dense<true> : vector<1x512xi1>
    %43 = arith.xori %42, %cst_12 : vector<1x512xi1>
    %c510_i32 = arith.constant 510 : i32
    %44 = tpu.dynamic_rotate %33 by %c510_i32 dim 1 : vector<1x512xf32>, i32 -> vector<1x512xf32>
    %c2_i32_13 = arith.constant 2 : i32
    %45 = tpu.dynamic_rotate %33 by %c2_i32_13 dim 1 : vector<1x512xf32>, i32 -> vector<1x512xf32>
    %46 = arith.select %41, %44, %45 : vector<1x512xi1>, vector<1x512xf32>
    %47 = arith.maximumf %33, %46 : vector<1x512xf32>
    %48 = arith.minimumf %33, %46 : vector<1x512xf32>
    %49 = arith.select %43, %47, %48 : vector<1x512xi1>, vector<1x512xf32>
    %c1_i32_14 = arith.constant 1 : i32
    %50 = vector.broadcast %c1_i32_14 : i32 to vector<1x512xi32>
    %51 = arith.andi %17, %50 : vector<1x512xi32>
    %c0_i32_15 = arith.constant 0 : i32
    %52 = vector.broadcast %c0_i32_15 : i32 to vector<1x512xi32>
    %53 = arith.cmpi eq, %51, %52 : vector<1x512xi32>
    %54 = arith.xori %53, %37 : vector<1x512xi1>
    %cst_16 = arith.constant dense<true> : vector<1x512xi1>
    %55 = arith.xori %54, %cst_16 : vector<1x512xi1>
    %c511_i32_17 = arith.constant 511 : i32
    %56 = tpu.dynamic_rotate %49 by %c511_i32_17 dim 1 : vector<1x512xf32>, i32 -> vector<1x512xf32>
    %c1_i32_18 = arith.constant 1 : i32
    %57 = tpu.dynamic_rotate %49 by %c1_i32_18 dim 1 : vector<1x512xf32>, i32 -> vector<1x512xf32>
    %58 = arith.select %53, %56, %57 : vector<1x512xi1>, vector<1x512xf32>
    %59 = arith.maximumf %49, %58 : vector<1x512xf32>
    %60 = arith.minimumf %49, %58 : vector<1x512xf32>
    %61 = arith.select %55, %59, %60 : vector<1x512xi1>, vector<1x512xf32>
    %c0_19 = arith.constant 0 : index
    %c0_20 = arith.constant 0 : index
    %62 = vector.load %arg2[%c0_19, %c0_20] : memref<1x512xf32, #tpu.memory_space<vmem>>, vector<1x512xf32>
    tpu.vector_store %arg2[%c0_19, %c0_20], %61 {strides = array<i32>} : memref<1x512xf32, #tpu.memory_space<vmem>>, vector<1x512xf32>,
    return
  }
  func.func @transform_0(%arg0: i32) -> (i32, i32) {
    %c0_i32 = arith.constant 0 : i32
    %c0_i32_0 = arith.constant 0 : i32
    return %arg0, %c0_i32 : i32, i32
  }
  func.func @transform_1(%arg0: i32) -> (i32, i32) {
    %c0_i32 = arith.constant 0 : i32
    %c0_i32_0 = arith.constant 0 : i32
    return %arg0, %c0_i32 : i32, i32
  }
}

</mosaic_0001>

<bundles_post_ra>
// kernel: groupsort_forward.1
= control target key start
LH: loop header
LB: loop body
LE: loop exit
PB: predicated region body
PF: predicated region fallthrough
CT: control target
= control target key end

     0   :  { %v9_v0 = vlaneseq  ;;  %s364_s8 = smov 127   ;;  %v366_v19 = vmov 1966171168   ;;  %vm367_vm11 = vmmov 1   ;;  %s368_s9 = smov 126   ;;  %s603_s0 = inlined_call_operand.vmem [shape: f32[1,512], index: 0, kind: input, shape index: {}, may-alias: {0,1}]   ;;  %s604_s1 = inlined_call_operand.vmem [shape: f32[1,512], index: 1, kind: output, shape index: {}, may-alias: {0,1}]  }
   0x1   :  { %v384_v2 = vld [vmem:[%s603_s0] sm:$0xf]  ;;  %s365_s0 = smov 1   ;;  %v144_v20 = vunpack.c.l.s4 %v366_v19  ;;  %s369_s10 = smov 2  }
   0x2   :  { %v88_v1 = vshrl.u32 %v9_v0, 7  ;;  %v411_v11 = vand.u32 127, %v9_v0 }
   0x3   :  { %v145_v27 = vunpack.c.0.s8 %v144_v20 }
   0x4   :  { %v386_v3 = vsub.s32 2, %v88_v1  ;;  %v388_v4 = vsub.s32 0, %v88_v1  ;;  %v390_v5 = vsub.s32 3, %v88_v1  ;;  %v392_v6 = vsub.s32 1, %v88_v1 }
   0x5   :  { %v11_v12 = vadd.s32 128, %v411_v11  ;;  %v12_v13 = vadd.s32 256, %v411_v11  ;;  %v13_v14 = vadd.s32 384, %v411_v11  ;;  %v18_v18 = vand.u32 3, %v411_v11 }
   0x6   :  { %v98_v7 = vrot.slane %v384_v2, %v386_v3  ;;  %v90_v8 = vrot.slane %v384_v2, %v388_v4  ;;  %v102_v9 = vrot.slane %v384_v2, %v390_v5  ;;  %v94_v10 = vrot.slane %v384_v2, %v392_v6 }
   0x7   :  { %v25_v17 = vand.u32 3, %v11_v12  ;;  %v32_v21 = vand.u32 3, %v12_v13  ;;  %v39_v22 = vand.u32 3, %v13_v14  ;;  %v419_v26 = vand.u32 1, %v18_v18 }
   0x8   :  { %111 = vrot.lane.b32.xlu1 %v98_v7, %s364_s8  ;;  %107 = vrot.lane.b32.xlu0 %v90_v8, %s364_s8  ;;  %vm128_vm0 = vcmp.lt.s32.totalorder %v411_v11, 1  ;;  %vm115_vm1 = vcmp.lt.s32.totalorder %v411_v11, 127  ;;  %v429_v32 = vsub.s32 %v145_v27, %v88_v1  ;;  %v443_v40 = vand.u32 2, %v18_v18 }
   0x9   :  { %v417_v25 = vand.u32 1, %v25_v17  ;;  %v421_v28 = vand.u32 1, %v32_v21  ;;  %v423_v29 = vand.u32 1, %v39_v22  ;;  %vm74_vm3 = vcmp.eq.s32.totalorder %v419_v26, 0 }
   0xa   :  { %v435_v34 = vand.u32 2, %v25_v17  ;;  %vm66_vm7 = vcmp.eq.s32.totalorder %v443_v40, 0  ;;  %v465_v53 = vand.u32 2, %v39_v22  ;;  %v467_v54 = vand.u32 2, %v32_v21 }
   0xb   :  { %vm75_vm2 = vcmp.eq.s32.totalorder %v417_v25, 0  ;;  %vm76_vm4 = vcmp.eq.s32.totalorder %v421_v28, 0  ;;  %vm605_vm5 = vcmp.eq.s32.totalorder %v423_v29, 0  ;;  %vm78_vm9 = vmxor %vm74_vm3, %vm66_vm7 }
   0xc   :  { %113 = vrot.lane.b32.xlu1 %v102_v9, %s364_s8  ;;  %109 = vrot.lane.b32.xlu0 %v94_v10, %s364_s8  ;;  %vm67_vm6 = vcmp.eq.s32.totalorder %v435_v34, 0  ;;  %vm69_vm10 = vcmp.eq.s32.totalorder %v465_v53, 0  ;;  %vm68_vm13 = vcmp.eq.s32.totalorder %v467_v54, 0  ;;  %vm82_vm14 = vmxor %vm78_vm9, %vm367_vm11 }
   0xd   :  { %vm79_vm8 = vmxor %vm75_vm2, %vm67_vm6 }
   0xe   :  { %vm83_vm12 = vmxor %vm79_vm8, %vm367_vm11 }
   0xf   :  { %vm81_vm15 = vmxor %vm605_vm5, %vm69_vm10 }
  0x10   :  { %122 = vrot.lane.b32.xlu1 %v94_v10, %s365_s0  ;;  %120 = vrot.lane.b32.xlu0 %v90_v8, %s365_s0  ;;  %vm80_vm8 = vmxor %vm76_vm4, %vm68_vm13 }
  0x11   :  { %vm85_vm9 = vmxor %vm81_vm15, %vm367_vm11  ;;  %vm238_vm15 = vcmp.lt.s32.totalorder %v411_v11, 126 }
  0x14   :  { %126 = vrot.lane.b32.xlu1 %v102_v9, %s365_s0  ;;  %124 = vrot.lane.b32.xlu0 %v98_v7, %s365_s0 }
  0x7a   :  { %v112_v15 = vpop.permute.xlu1 %111  ;;  %v108_v16 = vpop.permute.xlu0 %107 }
  0x7e   :  { %v114_v23 = vpop.permute.xlu1 %113  ;;  %v110_v24 = vpop.permute.xlu0 %109 }
  0x7f   :  { %v116_v35 = vsel %vm115_vm1, %v112_v15, %v114_v23  ;;  %v119_v36 = vsel %vm115_vm1, %v114_v23, %v108_v16  ;;  %v117_v37 = vsel %vm115_vm1, %v110_v24, %v112_v15  ;;  %v118_v41 = vsel %vm115_vm1, %v108_v16, %v110_v24 }
  0x82   :  { %v123_v30 = vpop.permute.xlu1 %122  ;;  %v121_v31 = vpop.permute.xlu0 %120 }
  0x83   :  { %v131_v33 = vsel %vm128_vm0, %v121_v31, %v123_v30 }
  0x84   :  { %v134_v45 = vsel %vm75_vm2, %v117_v37, %v131_v33 }
  0x86   :  { %v127_v38 = vpop.permute.xlu1 %126  ;;  %v125_v39 = vpop.permute.xlu0 %124 }
  0x87   :  { %v132_v42 = vsel %vm128_vm0, %v127_v38, %v121_v31  ;;  %v129_v43 = vsel %vm128_vm0, %v125_v39, %v127_v38  ;;  %v130_v44 = vsel %vm128_vm0, %v123_v30, %v125_v39 }
  0x88   :  { %v133_v46 = vsel %vm74_vm3, %v118_v41, %v132_v42  ;;  %v135_v47 = vsel %vm76_vm4, %v116_v35, %v130_v44  ;;  %v136_v48 = vsel %vm605_vm5, %v119_v36, %v129_v43  ;;  %vm84_vm5 = vmxor %vm80_vm8, %vm367_vm11 }
  0x89   :  { %v141_v49 = vcombine.low %v133_v46, %v134_v45  ;;  %v142_v50 = vcombine.low %v135_v47, %v136_v48  ;;  %vm222_vm8 = vmxor %vm66_vm7, %vm367_vm11 }
  0x8b   :  { %v149_v51 = vrot.slane %v141_v49, %v429_v32  ;;  %v156_v52 = vrot.slane %v142_v50, %v429_v32 }
  0x8d   :  { %v157_v55 = vcombine.low %v149_v51, %v156_v52 }
  0x8f   :  { %v164_v56 = vrot.slane %v157_v55, %v429_v32 }
  0x91   :  { %v166_v57 = vmax.f32 %v384_v2, %v164_v56  ;;  %v167_v58 = vmin.f32 %v384_v2, %v164_v56 }
  0x93   :  { %v176_v59 = vrot.slane %v166_v57, %v392_v6  ;;  %v197_v60 = vrot.slane %v167_v58, %v392_v6  ;;  %v172_v61 = vrot.slane %v166_v57, %v388_v4  ;;  %v193_v62 = vrot.slane %v167_v58, %v388_v4 }
  0x94   :  { %v184_v63 = vrot.slane %v166_v57, %v390_v5  ;;  %v205_v1 = vrot.slane %v167_v58, %v390_v5  ;;  %v180_v8 = vrot.slane %v166_v57, %v386_v3  ;;  %v201_v6 = vrot.slane %v167_v58, %v386_v3 }
  0x95   :  { %v211_v2 = vsel %vm83_vm12, %v176_v59, %v197_v60  ;;  %v210_v7 = vsel %vm82_vm14, %v172_v61, %v193_v62  ;;  %vm251_vm12 = vcmp.lt.s32.totalorder %v411_v11, 2  ;;  %vm223_vm14 = vmxor %vm67_vm6, %vm367_vm11 }
  0x96   :  { %232 = vrot.lane.b32.xlu1 %v211_v2, %s368_s9  ;;  %230 = vrot.lane.b32.xlu0 %v210_v7, %s368_s9  ;;  %v213_v4 = vsel %vm85_vm9, %v184_v63, %v205_v1  ;;  %v212_v9 = vsel %vm84_vm5, %v180_v8, %v201_v6  ;;  %vm227_vm5 = vmxor %vm223_vm14, %vm367_vm11 }
  0x97   :  { %vm518_vm9 = vmxor %vm69_vm10, %vm367_vm11 }
  0x98   :  { %vm229_vm14 = vmxor %vm518_vm9, %vm367_vm11  ;;  %vm610_vm9 = vcmp.eq.s32.totalorder %v423_v29, 0 }
  0x9a   :  { %236 = vrot.lane.b32.xlu1 %v213_v4, %s368_s9  ;;  %234 = vrot.lane.b32.xlu0 %v212_v9, %s368_s9 }
  0x9e   :  { %245 = vrot.lane.b32.xlu1 %v211_v2, %s369_s10  ;;  %243 = vrot.lane.b32.xlu0 %v210_v7, %s369_s10 }
  0xa2   :  { %249 = vrot.lane.b32.xlu1 %v213_v4, %s369_s10  ;;  %247 = vrot.lane.b32.xlu0 %v212_v9, %s369_s10 }
 0x108   :  { %v233_v5 = vpop.permute.xlu1 %232  ;;  %v231_v10 = vpop.permute.xlu0 %230 }
 0x109   :  { %v241_v21 = vsel %vm238_vm15, %v231_v10, %v233_v5 }
 0x10c   :  { %v237_v12 = vpop.permute.xlu1 %236  ;;  %v235_v13 = vpop.permute.xlu0 %234 }
 0x10d   :  { %v240_v15 = vsel %vm238_vm15, %v233_v5, %v235_v13  ;;  %v242_v22 = vsel %vm238_vm15, %v237_v12, %v231_v10  ;;  %v239_v23 = vsel %vm238_vm15, %v235_v13, %v237_v12  ;;  %vm559_vm15 = vmxor %vm76_vm4, %vm367_vm11 }
 0x110   :  { %v246_v3 = vpop.permute.xlu1 %245  ;;  %v244_v14 = vpop.permute.xlu0 %243 }
 0x111   :  { %v254_v16 = vsel %vm251_vm12, %v244_v14, %v246_v3 }
 0x112   :  { %v257_v17 = vsel %vm67_vm6, %v240_v15, %v254_v16  ;;  %vm226_vm6 = vmxor %vm222_vm8, %vm367_vm11 }
 0x113   :  { %v261_v18 = vmax.f32 %v211_v2, %v257_v17  ;;  %v265_v19 = vmin.f32 %v211_v2, %v257_v17 }
 0x114   :  { %v250_v24 = vpop.permute.xlu1 %249  ;;  %v248_v27 = vpop.permute.xlu0 %247 }
 0x115   :  { %v255_v30 = vsel %vm251_vm12, %v250_v24, %v244_v14  ;;  %v252_v31 = vsel %vm251_vm12, %v248_v27, %v250_v24  ;;  %v253_v33 = vsel %vm251_vm12, %v246_v3, %v248_v27  ;;  %v269_v34 = vsel %vm227_vm5, %v261_v18, %v265_v19  ;;  %vm224_vm12 = vmxor %vm68_vm13, %vm367_vm11 }
 0x116   :  { %v256_v35 = vsel %vm66_vm7, %v241_v21, %v255_v30  ;;  %v258_v36 = vsel %vm68_vm13, %v239_v23, %v253_v33  ;;  %v259_v37 = vsel %vm69_vm10, %v242_v22, %v252_v31  ;;  %282 = vrot.lane.b32.xlu1 %v269_v34, %s364_s8  ;;  %vm228_vm7 = vmxor %vm224_vm12, %vm367_vm11 }
 0x117   :  { %v260_v38 = vmax.f32 %v210_v7, %v256_v35  ;;  %v264_v39 = vmin.f32 %v210_v7, %v256_v35  ;;  %v263_v41 = vmax.f32 %v213_v4, %v259_v37  ;;  %v267_v40 = vmin.f32 %v213_v4, %v259_v37  ;;  %vm272_vm10 = vmxor %vm74_vm3, %vm367_vm11 }
 0x118   :  { %v262_v42 = vmax.f32 %v212_v9, %v258_v36  ;;  %v266_v43 = vmin.f32 %v212_v9, %v258_v36  ;;  %vm273_vm13 = vmxor %vm75_vm2, %vm367_vm11 }
 0x119   :  { %v268_v44 = vsel %vm226_vm6, %v260_v38, %v264_v39  ;;  %v271_v45 = vsel %vm229_vm14, %v263_v41, %v267_v40  ;;  %vm276_vm5 = vmxor %vm272_vm10, %vm367_vm11 }
 0x11a   :  { %280 = vrot.lane.b32.xlu0 %v268_v44, %s364_s8  ;;  %286 = vrot.lane.b32.xlu1 %v271_v45, %s364_s8  ;;  %v270_v46 = vsel %vm228_vm7, %v262_v42, %v266_v43  ;;  %vm277_vm8 = vmxor %vm273_vm13, %vm367_vm11 }
 0x11b   :  { %vm275_vm6 = vmxor %vm610_vm9, %vm367_vm11 }
 0x11e   :  { %284 = vrot.lane.b32.xlu0 %v270_v46, %s364_s8  ;;  %294 = vrot.lane.b32.xlu1 %v269_v34, %s365_s0 }
 0x122   :  { %292 = vrot.lane.b32.xlu0 %v268_v44, %s365_s0  ;;  %298 = vrot.lane.b32.xlu1 %v271_v45, %s365_s0 }
 0x126   :  { %296 = vrot.lane.b32.xlu0 %v270_v46, %s365_s0 }
 0x188   :  { %v283_v47 = vpop.permute.xlu1 %282 }
 0x18c   :  { %v281_v48 = vpop.permute.xlu0 %280  ;;  %v287_v49 = vpop.permute.xlu1 %286 }
 0x18d   :  { %v290_v57 = vsel %vm115_vm1, %v281_v48, %v283_v47  ;;  %v291_v7 = vsel %vm115_vm1, %v287_v49, %v281_v48 }
 0x190   :  { %v285_v50 = vpop.permute.xlu0 %284  ;;  %v295_v51 = vpop.permute.xlu1 %294 }
 0x191   :  { %v289_v54 = vsel %vm115_vm1, %v283_v47, %v285_v50  ;;  %v288_v25 = vsel %vm115_vm1, %v285_v50, %v287_v49  ;;  %vm279_vm1 = vmxor %vm275_vm6, %vm367_vm11 }
 0x194   :  { %v293_v52 = vpop.permute.xlu0 %292  ;;  %v299_v55 = vpop.permute.xlu1 %298 }
 0x195   :  { %v302_v56 = vsel %vm128_vm0, %v293_v52, %v295_v51  ;;  %v303_v58 = vsel %vm128_vm0, %v299_v55, %v293_v52 }
 0x196   :  { %v305_v59 = vsel %vm75_vm2, %v289_v54, %v302_v56  ;;  %v304_v60 = vsel %vm74_vm3, %v290_v57, %v303_v58  ;;  %vm278_vm2 = vmxor %vm559_vm15, %vm367_vm11 }
 0x197   :  { %v309_v61 = vmax.f32 %v269_v34, %v305_v59  ;;  %v313_v62 = vmin.f32 %v269_v34, %v305_v59  ;;  %v308_v63 = vmax.f32 %v268_v44, %v304_v60  ;;  %v312_v1 = vmin.f32 %v268_v44, %v304_v60  ;;  %vm611_vm3 = vmmov %vm610_vm9 }
 0x198   :  { %v297_v2 = vpop.permute.xlu0 %296 }
 0x199   :  { %v300_v8 = vsel %vm128_vm0, %v297_v2, %v299_v55  ;;  %v301_v26 = vsel %vm128_vm0, %v295_v51, %v297_v2  ;;  %v316_v6 = vsel %vm276_vm5, %v308_v63, %v312_v1  ;;  %v317_v4 = vsel %vm277_vm8, %v309_v61, %v313_v62 }
 0x19a   :  { %v306_v9 = vsel %vm76_vm4, %v288_v25, %v301_v26  ;;  %v307_v5 = vsel %vm611_vm3, %v291_v7, %v300_v8  ;;  %v324_v11 = vcombine.low %v316_v6, %v317_v4  ;;  %vm351_vm0 = vcmp.lt.s32.totalorder %v9_v0, 512 }
 0x19b   :  { %v310_v10 = vmax.f32 %v270_v46, %v306_v9  ;;  %v311_v12 = vmax.f32 %v271_v45, %v307_v5  ;;  %v314_v13 = vmin.f32 %v270_v46, %v306_v9  ;;  %v315_v3 = vmin.f32 %v271_v45, %v307_v5 }
 0x19c   :  { %v332_v17 = vrot.slane %v324_v11, %v429_v32 }
 0x19d   :  { %v318_v14 = vsel %vm278_vm2, %v310_v10, %v314_v13  ;;  %v319_v15 = vsel %vm279_vm1, %v311_v12, %v315_v3 }
 0x19e   :  { %v325_v16 = vcombine.low %v318_v14, %v319_v15 }
 0x1a0   :  { %v339_v18 = vrot.slane %v325_v16, %v429_v32 }
 0x1a2   :  { %v340_v19 = vcombine.low %v332_v17, %v339_v18 }
 0x1a4   :  { %v347_v28 = vrot.slane %v340_v19, %v429_v32 }
 0x1a6   :  { %353 = vst.msk [vmem:[%s604_s1] sm:$0xf] %vm351_vm0, %v347_v28 }

</bundles_post_ra>
